<compile_context>
chip_gen: v6e
topology: v6e:2x2x1
jax: 0.10.0
libtpu: 0.0.40
codegen_flags: <defaults>
</compile_context>

<pallas_src>
import functools
import math

import jax
import jax.numpy as jnp
from jax.experimental import pallas as pl
from jax.experimental.pallas import tpu as pltpu

_LANE = 128
_SUBLANE = 8


def _arcface_kernel(label_ref, cos_ref, out_ref, *, s, cos_m, sin_m, tc):
    x = cos_ref[...]                               # (tm, tc) cosines
    lbl = label_ref[...]                           # (tm, 1) int32 labels (-1 == ignore)

    # Global class index for every lane of this tile (offset by the C-tile origin).
    col0 = pl.program_id(1) * tc
    col = col0 + jax.lax.broadcasted_iota(jnp.int32, x.shape, dimension=1)
    is_target = jnp.logical_and(col == lbl, lbl != -1)      # (tm, tc) via broadcast

    # cos(acos(x) + m) = x*cos(m) - sqrt(1 - x^2)*sin(m); clamp the radicand so
    # |x| marginally above 1 (fp rounding) cannot produce NaN.
    xf = x.astype(jnp.float32)
    sin_theta = jnp.sqrt(jnp.maximum(jnp.float32(1.0) - xf * xf, jnp.float32(0.0)))
    target_val = xf * jnp.float32(s * cos_m) - sin_theta * jnp.float32(s * sin_m)

    out_ref[...] = jnp.where(is_target, target_val,
                             xf * jnp.float32(s)).astype(out_ref.dtype)


def _round_down(x, a):
    return max((x // a) * a, a)


def _round_up(x, a):
    return ((x + a - 1) // a) * a


def _vmem_limit_bytes():
    """Scoped-VMEM limit to request: half of physical VMEM, capped at 64 MiB.

    v5e/v6e (128 MiB physical) -> 64 MiB; v7x (64 MiB physical) -> 32 MiB.
    Falls back to 32 MiB (safe on every generation) if the query fails.
    """
    try:
        cap = getattr(pltpu.get_tpu_info(), "vmem_capacity_bytes", None)
        if not cap:
            cap = 64 << 20
    except Exception:
        cap = 64 << 20
    return int(min(cap // 2, 64 << 20))


def _pick_tiles(N, C, in_itemsize, out_itemsize, tm_pref=None, tc_pref=None):
    """Pick (tm, tc, vmem_limit): generation-aware, lane-dense, megacore-friendly."""
    vmem_limit = _vmem_limit_bytes()
    # Widen sublane alignment for packed (sub-32-bit) dtypes.
    sub_align = _SUBLANE * max(1, 4 // max(1, min(in_itemsize, out_itemsize)))

    # Lane axis: full C if small, otherwise a lane-dense multiple of 128.
    if tc_pref is None:
        tc_pref = 2048
    tc = C if C <= tc_pref else _round_down(tc_pref, _LANE)

    # Sublane axis: fill ~half of the scoped-VMEM limit with the two
    # double-buffered streams (cosine in + out); labels are negligible.
    if tm_pref is None:
        budget = vmem_limit // 2
        tm_pref = max(budget // (2 * tc * (in_itemsize + out_itemsize)), sub_align)
    tm = N if N <= tm_pref else _round_down(tm_pref, sub_align)

    # Megacore (v7x): keep >= 2 grid steps along a parallel axis so both
    # TensorCores get work.  Prefer splitting the class axis (stays lane-dense).
    if pl.cdiv(N, tm) * pl.cdiv(C, tc) < 2:
        if C > _LANE:
            tc_half = _round_up(pl.cdiv(C, 2), _LANE)
            tc = tc_half if tc_half < C else _LANE
        elif N > sub_align:
            tm_half = _round_up(pl.cdiv(N, 2), sub_align)
            tm = tm_half if tm_half < N else sub_align
    return tm, tc, vmem_limit


def arcface_forward(cosine, label, *, s=64.0, m=0.5, out_dtype=None,
                    tm=None, tc=None, inplace=False):
    """ArcFace forward.

    cosine: (N, C) float in [-1, 1]; label: (N,) int with -1 = ignore.
    out_dtype=jnp.bfloat16 halves store traffic (recommended when downstream
    softmax/CE upcasts).  inplace=True aliases cosine -> out; it only avoids
    the extra N*C allocation when the caller donates cosine (jit donate_argnums).
    """
    N, C = cosine.shape
    if out_dtype is None or inplace:
        out_dtype = cosine.dtype
    in_isz = jnp.dtype(cosine.dtype).itemsize
    out_isz = jnp.dtype(out_dtype).itemsize

    tm, tc, vmem_limit = _pick_tiles(N, C, in_isz, out_isz, tm_pref=tm, tc_pref=tc)

    label2d = label.reshape(N, 1).astype(jnp.int32)
    kernel = functools.partial(_arcface_kernel, s=float(s),
                               cos_m=math.cos(m), sin_m=math.sin(m), tc=tc)
    grid = (pl.cdiv(N, tm), pl.cdiv(C, tc))

    return pl.pallas_call(
        kernel,
        out_shape=jax.ShapeDtypeStruct((N, C), out_dtype),
        grid_spec=pltpu.PrefetchScalarGridSpec(
            num_scalar_prefetch=0,
            grid=grid,
            in_specs=[
                pl.BlockSpec((tm, 1), lambda i, j: (i, 0)),    # labels (re-used per C tile)
                pl.BlockSpec((tm, tc), lambda i, j: (i, j)),   # cosine tile
            ],
            out_specs=pl.BlockSpec((tm, tc), lambda i, j: (i, j)),
        ),
        compiler_params=pltpu.CompilerParams(
            dimension_semantics=("parallel", "parallel"),
            vmem_limit_bytes=vmem_limit),
        input_output_aliases=({1: 0} if inplace else {}),
    )(label2d, cosine)


if __name__ == "__main__":
    key = jax.random.PRNGKey(0)
    k_cos, k_lbl = jax.random.split(key)

    # Small demo shapes (real ArcFace: N ~ batch, C ~ 1e5..1e6 classes).
    N, C = 16, 256
    s, m = 64.0, 0.5

    cosine = jnp.tanh(jax.random.normal(k_cos, (N, C), dtype=jnp.float32))
    label = jax.random.randint(k_lbl, (N,), 0, C, dtype=jnp.int32)
    label = label.at[3].set(-1)          # one ignored row

    # Pure-JAX reference (same math as the PyTorch forward).
    col = jnp.arange(C)[None, :]
    is_target = (col == label[:, None]) & (label[:, None] != -1)
    margin = jnp.where(is_target, m, 0.0)
    ref = jnp.cos(jnp.arccos(jnp.clip(cosine, -1.0, 1.0)) + margin) * s

    # 1) Auto (generation-aware) tiles, f32 out.  Megacore guard splits the
    #    class axis here so the grid is not (1, 1).
    out = arcface_forward(cosine, label, s=s, m=m)
    jax.block_until_ready(out)
    assert jnp.allclose(out, ref, atol=1e-3, rtol=1e-3), "auto-tile mismatch"

    # 2) Explicit small tiles -> 2x2 grid; exercises both row tiling and the
    #    class-tile iota offset.
    out_tiled = arcface_forward(cosine, label, s=s, m=m, tm=8, tc=128)
    jax.block_until_ready(out_tiled)
    assert jnp.allclose(out_tiled, ref, atol=1e-3, rtol=1e-3), "tiled mismatch"

    # 3) bf16 output (memory-bound win on all generations).
    out_bf16 = arcface_forward(cosine, label, s=s, m=m, out_dtype=jnp.bfloat16)
    jax.block_until_ready(out_bf16)
    assert jnp.allclose(out_bf16.astype(jnp.float32), ref, atol=0.5, rtol=2e-2), \
        "bf16 mismatch"

    # 4) Recommended in-place path: alias cosine -> out AND donate the buffer.
    arc_inplace = jax.jit(
        functools.partial(arcface_forward, s=s, m=m, inplace=True),
        donate_argnums=(0,))
    out_ip = arc_inplace(cosine + 0.0, label)   # fresh copy so donation is legal
    jax.block_until_ready(out_ip)
    assert jnp.allclose(out_ip, ref, atol=1e-3, rtol=1e-3), "inplace mismatch"

    print("KERNEL_OK")
</pallas_src>

<mosaic_0001>
module attributes {stable_mosaic.version = 11 : i64} {
  func.func @_arcface_kernel(%arg0: i32, %arg1: i32, %arg2: memref<16x1xi32, #tpu.memory_space<vmem>>, %arg3: memref<16x128xf32, #tpu.memory_space<vmem>>, %arg4: memref<16x128xf32, #tpu.memory_space<vmem>>) attributes {dimension_semantics = [#tpu.dimension_semantics<parallel>, #tpu.dimension_semantics<parallel>], iteration_bounds = array<i64: 1, 2>, scalar_prefetch = 0 : i64, scratch_operands = 0 : i64, tpu.core_type = #tpu.core_type<tc>, window_params = [{transform_indices = @transform_0, window_bounds = array<i64: 16, 1>}, {transform_indices = @transform_1, window_bounds = array<i64: 16, 128>}, {transform_indices = @transform_2, window_bounds = array<i64: 16, 128>}]} {
    %c0 = arith.constant 0 : index
    %c0_0 = arith.constant 0 : index
    %0 = vector.load %arg3[%c0, %c0_0] : memref<16x128xf32, #tpu.memory_space<vmem>>, vector<16x128xf32>
    %c0_1 = arith.constant 0 : index
    %c0_2 = arith.constant 0 : index
    %1 = vector.load %arg2[%c0_1, %c0_2] : memref<16x1xi32, #tpu.memory_space<vmem>>, vector<16x1xi32>
    %c128_i32 = arith.constant 128 : i32
    %2 = arith.muli %arg1, %c128_i32 : i32
    %3 = tpu.iota {dimensions = array<i32: 1>} : vector<16x128xi32>
    %4 = vector.broadcast %2 : i32 to vector<16x128xi32>
    %5 = arith.addi %4, %3 : vector<16x128xi32>
    %6 = vector.broadcast %1 : vector<16x1xi32> to vector<16x128xi32>
    %7 = arith.cmpi eq, %5, %6 : vector<16x128xi32>
    %c-1_i32 = arith.constant -1 : i32
    %8 = vector.broadcast %c-1_i32 : i32 to vector<16x1xi32>
    %9 = arith.cmpi ne, %1, %8 : vector<16x1xi32>
    %10 = vector.broadcast %9 : vector<16x1xi1> to vector<16x128xi1>
    %11 = arith.andi %7, %10 : vector<16x128xi1>
    %12 = arith.mulf %0, %0 : vector<16x128xf32>
    %cst = arith.constant 1.000000e+00 : f32
    %13 = vector.broadcast %cst : f32 to vector<16x128xf32>
    %14 = arith.subf %13, %12 : vector<16x128xf32>
    %cst_3 = arith.constant 0.000000e+00 : f32
    %15 = vector.broadcast %cst_3 : f32 to vector<16x128xf32>
    %16 = arith.maximumf %14, %15 : vector<16x128xf32>
    %17 = math.sqrt %16 : vector<16x128xf32>
    %cst_4 = arith.constant 56.1652832 : f32
    %18 = vector.broadcast %cst_4 : f32 to vector<16x128xf32>
    %19 = arith.mulf %0, %18 : vector<16x128xf32>
    %cst_5 = arith.constant 30.6832352 : f32
    %20 = vector.broadcast %cst_5 : f32 to vector<16x128xf32>
    %21 = arith.mulf %17, %20 : vector<16x128xf32>
    %22 = arith.subf %19, %21 : vector<16x128xf32>
    %cst_6 = arith.constant 6.400000e+01 : f32
    %23 = vector.broadcast %cst_6 : f32 to vector<16x128xf32>
    %24 = arith.mulf %0, %23 : vector<16x128xf32>
    %25 = arith.select %11, %22, %24 : vector<16x128xi1>, vector<16x128xf32>
    %c0_7 = arith.constant 0 : index
    %c0_8 = arith.constant 0 : index
    %26 = vector.load %arg4[%c0_7, %c0_8] : memref<16x128xf32, #tpu.memory_space<vmem>>, vector<16x128xf32>
    tpu.vector_store %arg4[%c0_7, %c0_8], %25 {strides = array<i32>} : memref<16x128xf32, #tpu.memory_space<vmem>>, vector<16x128xf32>,
    return
  }
  func.func @transform_0(%arg0: i32, %arg1: i32) -> (i32, i32) {
    %c0_i32 = arith.constant 0 : i32
    %c0_i32_0 = arith.constant 0 : i32
    return %arg0, %c0_i32 : i32, i32
  }
  func.func @transform_1(%arg0: i32, %arg1: i32) -> (i32, i32) {
    %c0_i32 = arith.constant 0 : i32
    return %arg0, %arg1 : i32, i32
  }
  func.func @transform_2(%arg0: i32, %arg1: i32) -> (i32, i32) {
    %c0_i32 = arith.constant 0 : i32
    return %arg0, %arg1 : i32, i32
  }
}

</mosaic_0001>

<bundles_post_ra>
// kernel: tpu_custom_call.1
= control target key start
LH: loop header
LB: loop body
LE: loop exit
PB: predicated region body
PF: predicated region fallthrough
CT: control target
= control target key end

     0   :  { %7 = vsyncpa [#allocation3], 0  ;;  %s765_s0 = inlined_call_operand.vmem [shape: s32[16,1], index: 0, kind: input, shape index: {}]   ;;  %s766_s1 = inlined_call_operand.hbm [shape: f32[16,256], index: 1, kind: input, shape index: {}]   ;;  %s767_s2 = inlined_call_operand.hbm [shape: f32[16,256], index: 2, kind: output, shape index: {}]  }
   0x1   :  { %9 = vsyncpa [#allocation3 + $0x1], 0 }
   0x2   :  { %10 = vsyncpa [#allocation4], 0 }
   0x3   :  { %12 = vsyncpa [#allocation4 + $0x1], 0  ;;  %s607_s9 = smov 0   ;;  %s609_s10 = smov 0  }
   0x4   :  { %s611_s11 = smov 0   ;;  %s613_s12 = smov 0  }
   0x5   :  { %s615_s13 = smov 0   ;;  %s617_s14 = smov 0  }
   0x6 LB: > { %s383_s15 = sadd.s32 4294967295, %s581_s14   ;;  %s384_s16 = sadd.s32 4294967294, %s581_s14   ;;  %s581_s14 = sphi %s617_s14, %s18_s14   ;;  %s577_s13 = sphi %s615_s13, %s778_s13   ;;  %s573_s12 = sphi %s613_s12, %s777_s12   ;;  %s569_s11 = sphi %s611_s11, %s776_s11   ;;  %s565_s10 = sphi %s609_s10, %s775_s10   ;;  %s561_s9 = sphi %s607_s9, %s774_s9  }
   0x7   : > { %s27_s17 = sadd.s32 1, %s577_s13  ;;  %s65_s18 = sadd.s32 1, %s569_s11 }
   0x8   : > { %p28_p0 = scmp.ge.s32.totalorder %s27_s17, 2  ;;  %p72_p1 = scmp.ne.s32.totalorder %s569_s11, %s565_s10 }
   0x9   : > { %p73_p2 = scmp.eq.s32.totalorder %s581_s14, 0  ;;  %p78_p3 = scmp.ne.s32.totalorder %s565_s10, %s561_s9 }
   0xa   : > { %s780_s17 = smov (%p28_p0, %s27_s17), 0  ;;  %p79_p5 = scmp.eq.s32.totalorder %s383_s15, 0 }
   0xb   : > { %p648_p4 = por %p73_p2, %p72_p1  ;;  %s61_s20 = ssub.s32 %s577_s13, %s780_s17 }
   0xc   : > { %p104_p6 = scmp.eq.s32.totalorder %s383_s15, 1  ;;  %p63_p7 = scmp.eq.s32.totalorder %s61_s20, 0 }
   0xd   : > { %p654_p8 = por %p79_p5, %p78_p3  ;;  %p110_p10 = scmp.eq.s32.totalorder %s384_s16, 1 }
   0xe   : > { %p658_p9 = por %p104_p6, %p72_p1  ;;  %p410_p13 = scmp.lt.s32.totalorder %s581_s14, 2 }
   0xf   : > { %s663_s23 = scalar_select %p63_p7, %s569_s11, %s65_s18  }
  0x10   : > { %p665_p11 = por %p110_p10, %p78_p3  ;;  %s139_s25 = sand.u32 1, %s569_s11  }
  0x11   : > { %s388_s26 = sshll.u32 %s139_s25, 4  ;;  %s389_s27 = sshll.u32 %s577_s13, 7 }
  0x12   : > { %s151_s30 = scalar_lea.hbm %s766_s1, %s389_s27  ;;  %s143_s3 = scalar_lea.vmem [#allocation2], %s388_s26 }
  0x13   : > { %s152_s4 = sshll.u32 %s143_s3, 4  ;;  %p678_p0 = pnand %p410_p13, %p648_p4  ;;  %s153_s4 = int_to_ptr.vmem [resolvable:$true] %s152_s4 }
  0x14   : > { %s140_s6 = scalar_lea.sflag [#allocation3], %s139_s25  ;;  %s486_s7 = scalar_lea.vmem %s153_s4, 256 }
  0x15   : > { %p475_p1 = pneg %p678_p0  ;;  %p487_p2 = scmp.ne.s32.totalorder %s153_s4, %s486_s7 }
  0x16   : > { %s583_s8 = smov [#allocation2]  }
  0x17   : > { %p489_p3 = pnand %p487_p2, %p475_p1  ;;  %s491_s15 = sshll.u32 %s583_s8, 4  ;;  %s492_s15 = int_to_ptr.vmem [resolvable:$false] %s491_s15 }
  0x18   : > { %s493_s16 = scalar_lea.vmem %s492_s15, 512  ;;  %p494_p6 = scmp.lt.s32.totalorder %s153_s4, %s492_s15 }
  0x19   : > { %p490_p5 = pneg %p489_p3  ;;  %p495_p7 = scmp.lt.s32.totalorder %s493_s16, %s486_s7 }
  0x1b   : > { %p496_p10 = por %p495_p7, %p494_p6 }
  0x1d   : > { %p497_p12 = pnand %p496_p10, %p490_p5 }
  0x1f   : > { %500 = shalt.err (!%p497_p12)
}
  0x20   : > { %s584_s18 = smov 256   ;;  %s585_s19 = smov 128  }
  0x21   : > { %s586_s20 = smov 8   ;;  %p390_p4 = scmp.ge.s32.totalorder %s581_s14, 1 }
  0x22   : > { %405 = dma.hbm_to_vmem [thread:$0]  (!%p678_p0), %s151_s30, 256, %s153_s4, %s140_s6, %s584_s18, %s585_s19, %s586_s20  }
  0x23   : > { %p160_p13 = scmp.lt.s32.totalorder %s581_s14, 3 }
  0x25   : > { %p161_p1 = pnand %p390_p4, %p160_p13 }
  0x26   : > { %s689_s25 = sand.u32 (!%p161_p1), 1, %s565_s10  }
  0x27   : > { %164 = sbr.rel (%p161_p1) target bundleno = 194 (0xc2), region = 28  ;;  %s391_s26 = sshll.u32 (!%p161_p1), %s689_s25, 4 }
  0x28   : > { %s167_s27 = scalar_lea.sflag (!%p161_p1), [#allocation3], %s689_s25  ;;  %s170_s28 = scalar_lea.vmem (!%p161_p1), [#allocation2], %s391_s26 }
  0x2c   : > { %552 = dma.done.wait (%p654_p8), %s167_s27, 256  }
  0x2d   : > { %554 = vsyncadd (%p654_p8), %s167_s27, 4294967040  ;;  %v587_v0 = vmov 0   ;;  %v206_v1 = vld [vmem:[%s765_s0] sm:$0xff]  ;;  %v207_v2 = vld [vmem:[%s765_s0 + $0x8] sm:$0xff]  ;;  %v209_v16 = vlaneseq  ;;  %s393_s21 = sshll.u32 %s573_s12, 7  ;;  %s195_s5 = scalar_lea.vmem [#allocation5], %s391_s26 }
  0x2e   : > { %467 = vset.pattern.permute.xlu0 %v587_v0  ;;  %468 = vset.pattern.permute.xlu1 %v587_v0  ;;  %vm221_vm0 = vcmp.ne.s32.totalorder %v206_v1, 4294967295  ;;  %vm222_vm1 = vcmp.ne.s32.totalorder %v207_v2, 4294967295  ;;  %v204_v5 = vld [vmem:[%s170_s28] sm:$0xff]  ;;  %v205_v7 = vld [vmem:[%s170_s28 + $0x8] sm:$0xff]  ;;  %v211_v21 = vstv %s393_s21  ;;  %s283_s6 = sshll.u32 %s195_s5, 4  ;;  %s715_s15 = scalar_lea.hbm %s767_s2, %s393_s21  ;;  %s717_s6 = int_to_ptr.vmem [resolvable:$true] %s283_s6 }
  0x2f   : > { %214 = vperm.xlu0 %467, %v206_v1   ;;  %v223_v3 = vsel %vm221_vm0, 1, %v587_v0  ;;  %v224_v4 = vsel %vm222_vm1, 1, %v587_v0  ;;  %v235_v6 = vmul.f32 %v204_v5, %v204_v5  ;;  %v236_v9 = vmul.f32 %v205_v7, %v205_v7  ;;  %s268_s16 = scalar_lea.sflag [#allocation4], %s689_s25  ;;  %s501_s18 = scalar_lea.vmem %s717_s6, 256 }
  0x30   : > { %226 = vperm.xlu1 %468, %v223_v3   ;;  %v210_v20 = vand.u32 127, %v209_v16  ;;  %v255_v26 = vmul.f32 56.165283, %v204_v5  ;;  %v261_v30 = vmul.f32 64.0, %v204_v5  ;;  %v256_v32 = vmul.f32 56.165283, %v205_v7  ;;  %p502_p8 = scmp.ne.s32.totalorder %s717_s6, %s501_s18 }
  0x31   : > { %v237_v8 = vsub.f32 1.0, %v235_v6  ;;  %v238_v11 = vsub.f32 1.0, %v236_v9  ;;  %v262_v38 = vmul.f32 64.0, %v205_v7  ;;  %s588_s12 = smov [#allocation5]  }
  0x32   : > { %v212_v25 = vadd.s32 %v211_v21, %v210_v20  ;;  %p503_p12 = pnand %p502_p8, %p658_p9  ;;  %s505_s19 = sshll.u32 %s588_s12, 4  ;;  %s506_s19 = int_to_ptr.vmem [resolvable:$false] %s505_s19 }
  0x33   : > { %217 = vperm.xlu0 %467, %v207_v2   ;;  %v239_v10 = vmax.f32 %v237_v8, 0.0  ;;  %v240_v12 = vmax.f32 %v238_v11, 0.0  ;;  %s507_s20 = scalar_lea.vmem %s506_s19, 512  ;;  %p508_p2 = scmp.lt.s32.totalorder %s717_s6, %s506_s19 }
  0x34   : > { %229 = vperm.xlu1 %468, %v224_v4   ;;  %p504_p0 = pneg %p503_p12  ;;  %p509_p3 = scmp.lt.s32.totalorder %s507_s20, %s501_s18 }
  0x35   : > { %469 = vrsqrt.f32 %v239_v10  ;;  %vm243_vm2 = vcmp.eq.f32.partialorder %v239_v10, inf  ;;  %v246_v17 = vand.u32 2147483648, %v239_v10  ;;  %vm245_vm3 = vcmp.eq.f32.partialorder %v239_v10, 0.0 }
  0x36   : > { %471 = vrsqrt.f32 %v240_v12  ;;  %vm250_vm4 = vcmp.eq.f32.partialorder %v240_v12, inf  ;;  %v253_v23 = vand.u32 2147483648, %v240_v12  ;;  %vm252_vm5 = vcmp.eq.f32.partialorder %v240_v12, 0.0  ;;  %p510_p5 = por %p509_p3, %p508_p2 }
  0x38   : > { %p511_p6 = pnand %p510_p5, %p504_p0 }
  0x42   : > { %v470_v13 = vpop.eup %469 }
  0x43   : > { %v242_v14 = vmul.f32 %v470_v13, %v239_v10  ;;  %v472_v15 = vpop.eup %471 }
  0x44   : > { %v249_v19 = vmul.f32 %v472_v15, %v240_v12 }
  0x45   : > { %v244_v18 = vsel %vm243_vm2, %v239_v10, %v242_v14 }
  0x46   : > { %v247_v22 = vsel %vm245_vm3, %v246_v17, %v244_v18  ;;  %v251_v24 = vsel %vm250_vm4, %v240_v12, %v249_v19 }
  0x47   : > { %v257_v27 = vmul.f32 30.683235, %v247_v22  ;;  %v254_v28 = vsel %vm252_vm5, %v253_v23, %v251_v24 }
  0x48   : > { %v258_v33 = vmul.f32 30.683235, %v254_v28 }
  0x49   : > { %v259_v31 = vsub.f32 %v255_v26, %v257_v27 }
  0x4a   : > { %v260_v37 = vsub.f32 %v256_v32, %v258_v33 }
  0xaa   : > { %v215_v29 = vpop.permute.xlu0 %214 }
  0xab   : > { %vm219_vm6 = vcmp.eq.s32.totalorder %v212_v25, %v215_v29  ;;  %v227_v34 = vpop.permute.xlu1 %226 }
  0xac   : > { %vm231_vm7 = vcmp.eq.s32.totalorder %v227_v34, 1 }
  0xad   : > { %vm233_vm8 = vmand %vm219_vm6, %vm231_vm7 }
  0xae   : > { %v218_v35 = vpop.permute.xlu0 %217  ;;  %v263_v36 = vsel %vm233_vm8, %v259_v31, %v261_v30 }
  0xaf   : > { %265 = vst [vmem:[%s195_s5] sm:$0xff] %v263_v36  ;;  %v230_v39 = vpop.permute.xlu1 %229  ;;  %vm220_vm9 = vcmp.eq.s32.totalorder %v212_v25, %v218_v35 }
  0xb0   : > { %vm232_vm10 = vcmp.eq.s32.totalorder %v230_v39, 1 }
  0xb1   : > { %vm234_vm11 = vmand %vm220_vm9, %vm232_vm10 }
  0xb2   : > { %v264_v40 = vsel %vm234_vm11, %v260_v37, %v262_v38 }
  0xb3   : > { %266 = vst [vmem:[%s195_s5 + $0x8] sm:$0xff] %v264_v40 }
  0xb4   : > { %514 = shalt.err (!%p511_p6)
}
  0xb5   : > { %s515_s26 = scalar_lea.hbm %s715_s15, 256  ;;  %s519_s29 = scalar_lea.hbm %s767_s2, 512 }
  0xb6   : > { %p516_p7 = scmp.ne.s32.totalorder %s715_s15, %s515_s26  ;;  %p520_p13 = scmp.lt.s32.totalorder %s715_s15, %s767_s2 }
  0xb7   : > { %p521_p1 = scmp.lt.s32.totalorder %s519_s29, %s515_s26 }
  0xb8   : > { %p517_p10 = pnand %p516_p7, %p658_p9 }
  0xb9   : > { %p522_p8 = por %p521_p1, %p520_p13 }
  0xba   : > { %p518_p4 = pneg %p517_p10 }
  0xbc   : > { %p523_p12 = pnand %p522_p8, %p518_p4 }
  0xbe   : > { %526 = shalt.err (!%p523_p12)
}
  0xbf   : > { %s589_s4 = smov 128   ;;  %s590_s21 = smov 256  }
  0xc0   : > { %s591_s5 = smov 8  }
  0xc1   : > { %400 = dma.vmem_to_hbm [thread:$0]  (%p658_p9), %s717_s6, 256, %s715_s15, %s268_s16, %s589_s4, %s590_s21, %s591_s5  }
  0xc2 PF: > { %s298_s7 = sand.u32 1, %s561_s9   ;;  %p773_p0 = scmp.ge.s32.totalorder %s581_s14, 2 }
  0xc3   : > { %s299_s8 = scalar_lea.sflag [#allocation4], %s298_s7 }
  0xc4   : > { %p407_p2 = pnand %p773_p0, %p665_p11 }
  0xc6   : > { %p408_p3 = pneg %p407_p2 }
  0xc8   : > { %556 = dma.done.wait (%p408_p3), %s299_s8, 256  }
  0xc9   : > { %558 = vsyncadd (%p408_p3), %s299_s8, 4294967040  ;;  %s18_s14 = sadd.s32 1, %s581_s14   ;;  %s774_s9 = smov %s565_s10 }
  0xca   : > { %p15_p5 = scmp.ge.s32.totalorder %s18_s14, 4   ;;  %s775_s10 = smov %s569_s11 }
  0xcb   : > { %s776_s11 = smov %s663_s23  ;;  %s777_s12 = smov %s577_s13 }
  0xcc   : > { %s778_s13 = smov %s780_s17  ;;  %17 = sbr.rel (!%p15_p5) target bundleno = 6 (0x6), region = 76 }
  0xd1   :  { %304 = vsyncpa [#allocation3], 1 }
  0xd2   :  { %306 = vsyncpa [#allocation3 + $0x1], 1 }
  0xd3   :  { %307 = vsyncpa [#allocation4], 1 }
  0xd4   :  { %309 = vsyncpa [#allocation4 + $0x1], 1 }

</bundles_post_ra>
